<compile_context>
chip_gen: v6e
topology: v6e:2x2x1
jax: 0.10.0
libtpu: 0.0.40
codegen_flags: <defaults>
</compile_context>

<pallas_src>
import jax
import jax.numpy as jnp
from jax import lax
from jax.experimental import pallas as pl
from jax.experimental.pallas import tpu as pltpu


# ----------------------------------------------------------------------------
# Glue: deterministic construction of the sinusoid table (module __init__).
# ----------------------------------------------------------------------------
def build_encoding_table(max_len: int, d_model: int) -> jnp.ndarray:
    """Replicates TwoDPositionalEncoding.__init__ table construction (fp32).

    Returns encoding of shape (max_len, max_len, d_model) where
    encoding[x, y, :] = concat(enc1d[x], enc1d[y]) and enc1d is the standard
    sinusoid table of width d_model // 2.
    """
    d_half = d_model // 2
    pos = jnp.arange(max_len, dtype=jnp.float32)[:, None]           # (L, 1)
    _2i = jnp.arange(0, d_half, 2, dtype=jnp.float32)                # (d_half/2,)
    angle = pos / (10000.0 ** (_2i / d_half))                        # (L, d_half/2)
    enc1d = jnp.zeros((max_len, d_half), dtype=jnp.float32)
    enc1d = enc1d.at[:, 0::2].set(jnp.sin(angle))
    enc1d = enc1d.at[:, 1::2].set(jnp.cos(angle))
    ex = jnp.broadcast_to(enc1d[:, None, :], (max_len, max_len, d_half))
    ey = jnp.broadcast_to(enc1d[None, :, :], (max_len, max_len, d_half))
    return jnp.concatenate([ex, ey], axis=-1)                        # (L, L, D)


# ----------------------------------------------------------------------------
# Pallas kernel #1: transposed one-hot @ table gather on the MXU (small table).
# ----------------------------------------------------------------------------
def _gather_kernel_t(idx_ref, enc_t_ref, out_ref):
    # idx_ref:   (1, TM)  int32  lane-dense flat row indices (clipped in wrapper)
    # enc_t_ref: (D, L2)  table, transposed (encoding rows along the lane axis)
    # out_ref:   (D, TM)  gathered rows, transposed; last dim TM >= 128 so the
    #                     stores are unmasked / lane-dense.
    L2 = enc_t_ref.shape[1]
    # Sublane iota (L2, 1) broadcast against the lane-dense (1, TM) index row.
    # Single bool -> table-dtype cast (v5e-friendly: one cast, no bf16 VPU churn).
    rows = lax.broadcasted_iota(jnp.int32, (L2, 1), 0)               # (L2, 1)
    onehot = (rows == idx_ref[...]).astype(enc_t_ref.dtype)          # (L2, TM)
    # (D, L2) @ (L2, TM) -> (D, TM); f32 MXU accumulate, store in table dtype
    # (exact: each output column has exactly one nonzero one-hot entry).
    out_ref[...] = jnp.dot(enc_t_ref[...], onehot,
                           preferred_element_type=jnp.float32
                           ).astype(out_ref.dtype)


# ----------------------------------------------------------------------------
# Pallas kernel #2: scalar-prefetch row gather (large-table path, L2 > 4096).
# DMAs only the requested rows: O(M*D) bytes, no full-table VMEM residency.
# ----------------------------------------------------------------------------
def _row_gather_kernel(idx_ref, row_ref, out_ref):
    del idx_ref  # consumed by the data-dependent index_map
    out_ref[...] = row_ref[...]


def _dma_row_gather(flat: jnp.ndarray, enc_flat: jnp.ndarray) -> jnp.ndarray:
    M = flat.shape[0]
    L2, D = enc_flat.shape
    return pl.pallas_call(
        _row_gather_kernel,
        out_shape=jax.ShapeDtypeStruct((M, D), enc_flat.dtype),
        grid_spec=pltpu.PrefetchScalarGridSpec(
            num_scalar_prefetch=1,
            grid=(M,),
            in_specs=[pl.BlockSpec((1, D), lambda i, idx: (idx[i], 0))],
            out_specs=pl.BlockSpec((1, D), lambda i, idx: (i, 0)),
        ),
        compiler_params=pltpu.CompilerParams(
            dimension_semantics=("arbitrary",)),
    )(flat, enc_flat)


# ----------------------------------------------------------------------------
# Wrapper (forward pass, concat=False path => output width == d_model == args.emb)
# ----------------------------------------------------------------------------
def twod_positional_encoding(tokens: jnp.ndarray,
                             enc_flat: jnp.ndarray,
                             max_len: int,
                             *,
                             tile_m: int = 512,
                             use_pallas: bool | None = None,
                             out_dtype=jnp.float32) -> jnp.ndarray:
    """tokens:   (B, T, 2) float32 normalized (x, y) coordinates.
       enc_flat: (max_len*max_len, d_model) encoding table (bf16 recommended;
                 pass f32 for near-bit-exact parity with the torch module).
       Returns (B, T, d_model) in out_dtype, matching torch forward (concat=False)."""
    B, T, two = tokens.shape
    assert two == 2
    L2, D = enc_flat.shape
    assert L2 == max_len * max_len

    # ---- index precompute (trivial fused XLA ops, keeps the kernel lane-dense) --
    visible_range = 9.0                     # assumes max_len >= 10 (see module)
    idx = jnp.round(tokens.astype(jnp.float32) * visible_range).astype(jnp.int32)
    idx = jnp.clip(idx, 0, max_len - 1)     # explicit, deterministic OOB behavior
    flat = (idx[:, :, 0] * max_len + idx[:, :, 1]).reshape(B * T)    # (M,) int32

    M = B * T
    if use_pallas is None:
        use_pallas = M >= 512               # launch-overhead-bound below this

    if not use_pallas:
        # Small-M fast path: a fused XLA gather beats any pallas_call here.
        gathered = jnp.take(enc_flat, flat, axis=0)                  # (M, D)
        return gathered.astype(out_dtype).reshape(B, T, D)

    if L2 > 4096:
        # Large-table path: one-hot matmul is O(M*L2*D) and forces full-table
        # VMEM residency; DMA-gather only the needed rows instead.
        gathered = _dma_row_gather(flat, enc_flat)                   # (M, D)
        return gathered.astype(out_dtype).reshape(B, T, D)

    # ---- tile selection: lane-dense (>=128), big (default 512), but keep ------
    # ---- num_tiles >= 2 when M allows so v7x's two TensorCores both work. -----
    TM_MIN = 128
    tile_m = max(TM_MIN, (tile_m // TM_MIN) * TM_MIN)
    M_pad128 = ((M + TM_MIN - 1) // TM_MIN) * TM_MIN
    if M_pad128 <= TM_MIN:
        TM = TM_MIN                               # single lane-dense tile
    else:
        half = (M_pad128 // 2 // TM_MIN) * TM_MIN  # cap so >= 2 tiles remain
        TM = max(TM_MIN, min(tile_m, half))
    M_pad = ((M + TM - 1) // TM) * TM
    num_tiles = M_pad // TM

    # Padded tail indices gather table row 0 and are discarded below.
    flat_padded = jnp.pad(flat, (0, M_pad - M)).reshape(1, M_pad)    # (1, M_pad)

    # Transposed table: rows along the lane axis.  (In a module this transpose
    # would be precomputed once at init; it is tiny here.)
    enc_t = enc_flat.T                                               # (D, L2)

    # VMEM budget: raise the scoped limit only if the double-buffered table +
    # one-hot intermediate would exceed the conservative 16 MiB default (v5e).
    itemsize = jnp.dtype(enc_flat.dtype).itemsize
    vmem_est = (2 * L2 * D * itemsize        # table (double-buffered by pipeline)
                + 2 * 1 * TM * 4             # index blocks
                + 2 * D * TM * itemsize      # output blocks
                + TM * L2 * itemsize)        # one-hot intermediate
    vmem_limit = None
    if vmem_est > 16 * 1024 * 1024:
        vmem_limit = int(min(vmem_est * 2, 100 * 1024 * 1024))

    out_t = pl.pallas_call(
        _gather_kernel_t,
        out_shape=jax.ShapeDtypeStruct((D, M_pad), enc_flat.dtype),
        grid=(num_tiles,),
        in_specs=[
            # lane-dense per-tile index row
            pl.BlockSpec((1, TM), lambda i: (0, i)),
            # full transposed table, resident across the grid (constant block)
            pl.BlockSpec((D, L2), lambda i: (0, 0)),
        ],
        out_specs=pl.BlockSpec((D, TM), lambda i: (0, i)),
        compiler_params=pltpu.CompilerParams(
            # row tiles are independent -> megacore-shardable on v7x
            dimension_semantics=("parallel",),
            vmem_limit_bytes=vmem_limit),
    )(flat_padded, enc_t)                                            # (D, M_pad)

    return out_t.T[:M].astype(out_dtype).reshape(B, T, D)


# ----------------------------------------------------------------------------
# Main
# ----------------------------------------------------------------------------
if __name__ == "__main__":
    # Small shapes consistent with the module:
    #   args.emb == d_model == 32, max_len == 16 (>= visible_range + 1 = 10)
    B, T = 2, 8
    d_model = 32
    max_len = 16

    key = jax.random.PRNGKey(0)
    # Normalized coordinates in [0, 1): round(9 * tok) lands in [0, 9] < max_len.
    tokens = jax.random.uniform(key, (B, T, 2), dtype=jnp.float32)

    enc_table = build_encoding_table(max_len, d_model)                # (L, L, D) f32
    enc_flat = enc_table.reshape(max_len * max_len, d_model)          # (L*L, D)
    enc_flat_bf16 = enc_flat.astype(jnp.bfloat16)                     # MXU-native

    # Exercise the Pallas (transposed one-hot MXU gather) path explicitly; at
    # M = B*T = 16 the auto heuristic would take the small-M XLA fast path.
    out = twod_positional_encoding(tokens, enc_flat_bf16, max_len, use_pallas=True)
    out = jax.block_until_ready(out)

    # Pure-JAX reference of the forward pass (concat=False path), fp32 table.
    ridx = jnp.clip(jnp.round(tokens * 9.0).astype(jnp.int32), 0, max_len - 1)
    ref = enc_table[ridx[:, :, 0], ridx[:, :, 1], :]                  # (B, T, D)

    assert out.shape == (B, T, d_model)
    assert out.dtype == jnp.float32
    # bf16 table rounding: sin/cos magnitudes <= 1 -> abs error <= ~4e-3.
    # (Passing an f32 table instead restores near-bit-exact parity.)
    assert jnp.allclose(out, ref, atol=5e-3, rtol=0.0), \
        float(jnp.max(jnp.abs(out - ref)))

    # The auto (small-M XLA gather) path must agree with the kernel path.
    out_auto = jax.block_until_ready(
        twod_positional_encoding(tokens, enc_flat_bf16, max_len))
    assert jnp.allclose(out_auto, out, atol=1e-6, rtol=0.0)

    # TODO(synk): concat=True / args.use_identity branches only change the
    # preallocated width of pos_emb; they are shape-config glue, not kernel work.
    print("KERNEL_OK")
</pallas_src>

<mosaic_0001>
module attributes {stable_mosaic.version = 11 : i64} {
  func.func @_gather_kernel_t(%arg0: i32, %arg1: memref<1x128xi32, #tpu.memory_space<vmem>>, %arg2: memref<32x256xbf16, #tpu.memory_space<vmem>>, %arg3: memref<32x128xbf16, #tpu.memory_space<vmem>>) attributes {dimension_semantics = [#tpu.dimension_semantics<parallel>], iteration_bounds = array<i64: 1>, scalar_prefetch = 0 : i64, scratch_operands = 0 : i64, tpu.core_type = #tpu.core_type<tc>, window_params = [{transform_indices = @transform_0, window_bounds = array<i64: 1, 128>}, {pipeline_mode = #tpu.pipeline_mode<synchronous>, transform_indices = @transform_1, window_bounds = array<i64: 32, 256>}, {transform_indices = @transform_2, window_bounds = array<i64: 32, 128>}]} {
    %0 = tpu.iota {dimensions = array<i32: 0>} : vector<256x1xi32>
    %c0 = arith.constant 0 : index
    %c0_0 = arith.constant 0 : index
    %1 = vector.load %arg1[%c0, %c0_0] : memref<1x128xi32, #tpu.memory_space<vmem>>, vector<1x128xi32>
    %2 = vector.broadcast %0 : vector<256x1xi32> to vector<256x128xi32>
    %3 = vector.broadcast %1 : vector<1x128xi32> to vector<256x128xi32>
    %4 = arith.cmpi eq, %2, %3 : vector<256x128xi32>
    %5 = arith.extui %4 : vector<256x128xi1> to vector<256x128xi32>
    %6 = arith.sitofp %5 : vector<256x128xi32> to vector<256x128xf32>
    %7 = arith.truncf %6 : vector<256x128xf32> to vector<256x128xbf16>
    %c0_1 = arith.constant 0 : index
    %c0_2 = arith.constant 0 : index
    %8 = vector.load %arg2[%c0_1, %c0_2] : memref<32x256xbf16, #tpu.memory_space<vmem>>, vector<32x256xbf16>
    %cst = arith.constant dense<0.000000e+00> : vector<32x128xf32>
    %9 = tpu.matmul %8, %7, %cst {dimension_numbers = #tpu.dot_dimension_numbers<[1], [0], [0], [1], [0, 0, 1, 1], [], []>} : vector<32x256xbf16>, vector<256x128xbf16>, vector<32x128xf32> -> vector<32x128xf32>
    %10 = arith.truncf %9 : vector<32x128xf32> to vector<32x128xbf16>
    %c0_3 = arith.constant 0 : index
    %c0_4 = arith.constant 0 : index
    %11 = vector.load %arg3[%c0_3, %c0_4] : memref<32x128xbf16, #tpu.memory_space<vmem>>, vector<32x128xbf16>
    tpu.vector_store %arg3[%c0_3, %c0_4], %10 {strides = array<i32>} : memref<32x128xbf16, #tpu.memory_space<vmem>>, vector<32x128xbf16>,
    return
  }
  func.func @transform_0(%arg0: i32) -> (i32, i32) {
    %c0_i32 = arith.constant 0 : i32
    %c0_i32_0 = arith.constant 0 : i32
    return %c0_i32, %arg0 : i32, i32
  }
  func.func @transform_1(%arg0: i32) -> (i32, i32) {
    %c0_i32 = arith.constant 0 : i32
    %c0_i32_0 = arith.constant 0 : i32
    %c0_i32_1 = arith.constant 0 : i32
    return %c0_i32, %c0_i32_0 : i32, i32
  }
  func.func @transform_2(%arg0: i32) -> (i32, i32) {
    %c0_i32 = arith.constant 0 : i32
    %c0_i32_0 = arith.constant 0 : i32
    return %c0_i32, %arg0 : i32, i32
  }
}

</mosaic_0001>

<bundles_post_ra>
// kernel: tpu_custom_call.1
= control target key start
LH: loop header
LB: loop body
LE: loop exit
PB: predicated region body
PF: predicated region fallthrough
CT: control target
= control target key end

     0   :  { %7 = vsyncpa [#allocation3], 0  ;;  %s650_s0 = inlined_call_operand.hbm [shape: s32[1,128], index: 0, kind: input, shape index: {}]   ;;  %s651_s1 = inlined_call_operand.hbm [shape: bf16[32,256], index: 1, kind: input, shape index: {}]   ;;  %s652_s2 = inlined_call_operand.hbm [shape: bf16[32,128], index: 2, kind: output, shape index: {}]  }
   0x1   :  { %8 = vsyncpa [#allocation6], 0 }
   0x2   :  { %9 = vsyncpa [#allocation4], 0  ;;  %s512_s9 = smov [#allocation2]   ;;  %s513_s11 = smov [#allocation5]  }
   0x3   :  { %s16_s10 = sshll.u32 %s512_s9, 4  ;;  %s25_s12 = sshll.u32 %s513_s11, 4  ;;  %s17_s10 = int_to_ptr.vmem [resolvable:$true] %s16_s10  ;;  %s26_s12 = int_to_ptr.vmem [resolvable:$true] %s25_s12 }
   0x4   :  { %s454_s13 = scalar_lea.vmem %s17_s10, 16  ;;  %s458_s14 = scalar_lea.vmem %s17_s10, 32 }
   0x5   :  { %p455_p0 = scmp.ne.s32.totalorder %s17_s10, %s454_s13  ;;  %p459_p1 = scmp.lt.s32.totalorder %s17_s10, %s17_s10 }
   0x6   :  { %p460_p2 = scmp.lt.s32.totalorder %s458_s14, %s454_s13 }
   0x8   :  { %p461_p3 = por %p460_p2, %p459_p1 }
   0xa   :  { %p462_p4 = pnand %p461_p3, %p455_p0 }
   0xc   :  { %465 = shalt.err (!%p462_p4)
}
   0xd   :  { %19 = dma.hbm_to_vmem [thread:$0]  %s650_s0, 16, %s17_s10, [#allocation3]  }
   0xe   :  { %s474_s17 = scalar_lea.vmem %s26_s12, 512  ;;  %p479_p6 = scmp.lt.s32.totalorder %s26_s12, %s26_s12 }
   0xf   :  { %p475_p5 = scmp.ne.s32.totalorder %s26_s12, %s474_s17  ;;  %p480_p7 = scmp.lt.s32.totalorder %s474_s17, %s474_s17 }
  0x11   :  { %p481_p8 = por %p480_p7, %p479_p6 }
  0x13   :  { %p482_p9 = pnand %p481_p8, %p475_p5 }
  0x15   :  { %485 = shalt.err (!%p482_p9)
}
  0x16   :  { %s514_s18 = smov 128   ;;  %s515_s19 = smov 8  }
  0x17   :  { %31 = dma.hbm_to_vmem [thread:$0]  %s651_s1, 512, %s26_s12, [#allocation6], %s514_s18, %s514_s18, %s515_s19  }
  0x18   :  { %506 = dma.done.wait [#allocation3], 16  }
  0x19   :  { %507 = vsyncadd [#allocation3], 4294967280 }
  0x1a   :  { %508 = dma.done.wait [#allocation6], 512  }
  0x1b   :  { %509 = vsyncadd [#allocation6], 4294966784  ;;  %v39_v0 = vlaneseq  ;;  %v553_v12 = vld [vmem:[#allocation2] ss:$0 sm:$0xff]  ;;  %v442_v15 = vld [vmem:[#allocation5 + $0x4] ss:$8 sps:$4 sm:$0xff]  }
  0x1c   :  { %v516_v16 = vmov 1.0|1.0   ;;  %v445_v19 = vld [vmem:[#allocation5 + $0x14] ss:$8 sps:$4 sm:$0xff]   ;;  %245 = vmatprep.mubr.bf16.mxu0 %v442_v15  ;;  %v440_v37 = vld [vmem:[#allocation5] ss:$8 sps:$4 sm:$0xff]  }
  0x1d   :  { %v541_v1 = vshrl.u32 %v39_v0, 7  ;;  %253 = vmatprep.mubr.bf16.mxu1 %v445_v19  ;;  %v443_v38 = vld [vmem:[#allocation5 + $0x10] ss:$8 sps:$4 sm:$0xff]   ;;  %s517_s0 = smov [#allocation7]  }
  0x1e   :  { %s287_s1 = sshll.u32 %s517_s0, 4  ;;  %s288_s1 = int_to_ptr.vmem [resolvable:$true] %s287_s1 }
  0x1f   :  { %v70_v2 = vadd.s32 240, %v541_v1  ;;  %v71_v3 = vadd.s32 248, %v541_v1  ;;  %v54_v4 = vadd.s32 112, %v541_v1  ;;  %v55_v5 = vadd.s32 120, %v541_v1  ;;  %s486_s22 = scalar_lea.vmem %s288_s1, 256  ;;  %p491_p11 = scmp.lt.s32.totalorder %s288_s1, %s288_s1 }
  0x20   :  { %v68_v6 = vadd.s32 224, %v541_v1  ;;  %v69_v7 = vadd.s32 232, %v541_v1  ;;  %v52_v8 = vadd.s32 96, %v541_v1  ;;  %v53_v9 = vadd.s32 104, %v541_v1  ;;  %p487_p10 = scmp.ne.s32.totalorder %s288_s1, %s486_s22  ;;  %p492_p12 = scmp.lt.s32.totalorder %s486_s22, %s486_s22 }
  0x21   :  { %v66_v10 = vadd.s32 208, %v541_v1  ;;  %v67_v11 = vadd.s32 216, %v541_v1  ;;  %v50_v13 = vadd.s32 80, %v541_v1  ;;  %v51_v14 = vadd.s32 88, %v541_v1 }
  0x22   :  { %vm107_vm0 = vcmp.eq.s32.totalorder %v70_v2, %v553_v12  ;;  %vm108_vm1 = vcmp.eq.s32.totalorder %v71_v3, %v553_v12  ;;  %vm91_vm2 = vcmp.eq.s32.totalorder %v54_v4, %v553_v12  ;;  %vm92_vm3 = vcmp.eq.s32.totalorder %v55_v5, %v553_v12  ;;  %p493_p13 = por %p492_p12, %p491_p11 }
  0x23   :  { %vm353_vm4 = vmpackc.low %vm108_vm1, %vm107_vm0  ;;  %vm105_vm5 = vcmp.eq.s32.totalorder %v68_v6, %v553_v12  ;;  %vm106_vm6 = vcmp.eq.s32.totalorder %v69_v7, %v553_v12  ;;  %vm89_vm7 = vcmp.eq.s32.totalorder %v52_v8, %v553_v12  ;;  %vm90_vm8 = vcmp.eq.s32.totalorder %v53_v9, %v553_v12 }
  0x24   :  { %388 = vmatprep.subr.msk.bf16.mxu0 %vm353_vm4, %v516_v16  ;;  %416 = vmatprep.subr.msk.bf16.mxu1 %vm353_vm4, %v516_v16  ;;  %vm337_vm9 = vmpackc.low %vm92_vm3, %vm91_vm2  ;;  %vm103_vm10 = vcmp.eq.s32.totalorder %v66_v10, %v553_v12  ;;  %vm104_vm11 = vcmp.eq.s32.totalorder %v67_v11, %v553_v12  ;;  %v64_v17 = vadd.s32 192, %v541_v1  ;;  %v65_v18 = vadd.s32 200, %v541_v1  ;;  %p494_p0 = pnand %p493_p13, %p487_p10 }
  0x25   :  { %389 = vmatpush3.bf16.msk.msra.mxu0 %vm337_vm9, %v516_v16  ;;  %424 = vmatpush3.bf16.msk.msra.mxu1 %vm337_vm9, %v516_v16  ;;  %vm355_vm12 = vmpackc.low %vm106_vm6, %vm105_vm5  ;;  %vm87_vm15 = vcmp.eq.s32.totalorder %v50_v13, %v553_v12  ;;  %vm88_vm0 = vcmp.eq.s32.totalorder %v51_v14, %v553_v12  ;;  %v48_v20 = vadd.s32 64, %v541_v1  ;;  %v49_v21 = vadd.s32 72, %v541_v1 }
  0x26   :  { %390 = vmatprep.subr.msk.bf16.mxu0 %vm355_vm12, %v516_v16  ;;  %417 = vmatprep.subr.msk.bf16.mxu1 %vm355_vm12, %v516_v16  ;;  %vm339_vm13 = vmpackc.low %vm90_vm8, %vm89_vm7  ;;  %vm101_vm1 = vcmp.eq.s32.totalorder %v64_v17, %v553_v12  ;;  %vm102_vm2 = vcmp.eq.s32.totalorder %v65_v18, %v553_v12  ;;  %v62_v22 = vadd.s32 176, %v541_v1  ;;  %v63_v23 = vadd.s32 184, %v541_v1 }
  0x27   :  { %vm357_vm14 = vmpackc.low %vm104_vm11, %vm103_vm10  ;;  %vm85_vm5 = vcmp.eq.s32.totalorder %v48_v20, %v553_v12  ;;  %vm86_vm6 = vcmp.eq.s32.totalorder %v49_v21, %v553_v12  ;;  %v46_v24 = vadd.s32 48, %v541_v1  ;;  %v47_v25 = vadd.s32 56, %v541_v1 }
  0x28   :  { %vm341_vm3 = vmpackc.low %vm88_vm0, %vm87_vm15  ;;  %vm99_vm7 = vcmp.eq.s32.totalorder %v62_v22, %v553_v12  ;;  %vm100_vm8 = vcmp.eq.s32.totalorder %v63_v23, %v553_v12  ;;  %v60_v26 = vadd.s32 160, %v541_v1  ;;  %v61_v27 = vadd.s32 168, %v541_v1 }
  0x29   :  { %391 = vmatpush3.bf16.msk.msra.mxu0 %vm339_vm13, %v516_v16  ;;  %425 = vmatpush3.bf16.msk.msra.mxu1 %vm339_vm13, %v516_v16  ;;  %vm359_vm4 = vmpackc.low %vm102_vm2, %vm101_vm1  ;;  %vm83_vm11 = vcmp.eq.s32.totalorder %v46_v24, %v553_v12  ;;  %vm84_vm12 = vcmp.eq.s32.totalorder %v47_v25, %v553_v12  ;;  %v44_v28 = vadd.s32 32, %v541_v1  ;;  %v45_v29 = vadd.s32 40, %v541_v1 }
  0x2a   :  { %392 = vmatprep.subr.msk.bf16.mxu0 %vm357_vm14, %v516_v16  ;;  %418 = vmatprep.subr.msk.bf16.mxu1 %vm357_vm14, %v516_v16  ;;  %vm343_vm9 = vmpackc.low %vm86_vm6, %vm85_vm5  ;;  %vm97_vm13 = vcmp.eq.s32.totalorder %v60_v26, %v553_v12  ;;  %vm98_vm14 = vcmp.eq.s32.totalorder %v61_v27, %v553_v12  ;;  %v58_v30 = vadd.s32 144, %v541_v1  ;;  %v59_v31 = vadd.s32 152, %v541_v1 }
  0x2b   :  { %vm361_vm10 = vmpackc.low %vm100_vm8, %vm99_vm7  ;;  %vm81_vm1 = vcmp.eq.s32.totalorder %v44_v28, %v553_v12  ;;  %vm82_vm2 = vcmp.eq.s32.totalorder %v45_v29, %v553_v12  ;;  %v42_v32 = vadd.s32 16, %v541_v1  ;;  %v43_v33 = vadd.s32 24, %v541_v1 }
  0x2c   :  { %vm345_vm15 = vmpackc.low %vm84_vm12, %vm83_vm11  ;;  %v56_v34 = vadd.s32 128, %v541_v1  ;;  %v57_v35 = vadd.s32 136, %v541_v1  ;;  %v41_v36 = vadd.s32 8, %v541_v1 }
  0x2d   :  { %393 = vmatpush3.bf16.msk.msra.mxu0 %vm341_vm3, %v516_v16  ;;  %426 = vmatpush3.bf16.msk.msra.mxu1 %vm341_vm3, %v516_v16  ;;  %vm363_vm0 = vmpackc.low %vm98_vm14, %vm97_vm13  ;;  %vm95_vm3 = vcmp.eq.s32.totalorder %v58_v30, %v553_v12  ;;  %vm79_vm7 = vcmp.eq.s32.totalorder %v42_v32, %v553_v12  ;;  %vm80_vm8 = vcmp.eq.s32.totalorder %v43_v33, %v553_v12 }
  0x2e   :  { %394 = vmatprep.subr.msk.bf16.mxu0 %vm359_vm4, %v516_v16  ;;  %419 = vmatprep.subr.msk.bf16.mxu1 %vm359_vm4, %v516_v16  ;;  %vm96_vm4 = vcmp.eq.s32.totalorder %v59_v31, %v553_v12  ;;  %vm347_vm5 = vmpackc.low %vm82_vm2, %vm81_vm1  ;;  %vm77_vm13 = vcmp.eq.s32.totalorder %v541_v1, %v553_v12  ;;  %vm78_vm14 = vcmp.eq.s32.totalorder %v41_v36, %v553_v12 }
  0x2f   :  { %vm365_vm6 = vmpackc.low %vm96_vm4, %vm95_vm3 }
  0x30   :  { %vm349_vm11 = vmpackc.low %vm80_vm8, %vm79_vm7 }
  0x31   :  { %395 = vmatpush3.bf16.msk.msra.mxu0 %vm343_vm9, %v516_v16  ;;  %427 = vmatpush3.bf16.msk.msra.mxu1 %vm343_vm9, %v516_v16  ;;  %vm93_vm9 = vcmp.eq.s32.totalorder %v56_v34, %v553_v12 }
  0x32   :  { %396 = vmatprep.subr.msk.bf16.mxu0 %vm361_vm10, %v516_v16  ;;  %420 = vmatprep.subr.msk.bf16.mxu1 %vm361_vm10, %v516_v16  ;;  %vm94_vm10 = vcmp.eq.s32.totalorder %v57_v35, %v553_v12 }
  0x33   :  { %vm367_vm12 = vmpackc.low %vm94_vm10, %vm93_vm9 }
  0x35   :  { %397 = vmatpush3.bf16.msk.msra.mxu0 %vm345_vm15, %v516_v16  ;;  %428 = vmatpush3.bf16.msk.msra.mxu1 %vm345_vm15, %v516_v16  ;;  %vm351_vm15 = vmpackc.low %vm78_vm14, %vm77_vm13 }
  0x36   :  { %398 = vmatprep.subr.msk.bf16.mxu0 %vm363_vm0, %v516_v16  ;;  %421 = vmatprep.subr.msk.bf16.mxu1 %vm363_vm0, %v516_v16 }
  0x39   :  { %399 = vmatpush3.bf16.msk.msra.mxu0 %vm347_vm5, %v516_v16  ;;  %429 = vmatpush3.bf16.msk.msra.mxu1 %vm347_vm5, %v516_v16 }
  0x3a   :  { %400 = vmatprep.subr.msk.bf16.mxu0 %vm365_vm6, %v516_v16  ;;  %422 = vmatprep.subr.msk.bf16.mxu1 %vm365_vm6, %v516_v16 }
  0x3d   :  { %401 = vmatpush3.bf16.msk.msra.mxu0 %vm349_vm11, %v516_v16  ;;  %430 = vmatpush3.bf16.msk.msra.mxu1 %vm349_vm11, %v516_v16 }
  0x3e   :  { %402 = vmatprep.subr.msk.bf16.mxu0 %vm367_vm12, %v516_v16  ;;  %423 = vmatprep.subr.msk.bf16.mxu1 %vm367_vm12, %v516_v16 }
  0x41   :  { %403 = vmatpush3.bf16.msk.msra.mxu0 %vm351_vm15, %v516_v16  ;;  %431 = vmatpush3.bf16.msk.msra.mxu1 %vm351_vm15, %v516_v16 }
  0x44   :  { %246 = vmatmul.mubr.bf16.vlgmr.msra.gmra.mxu0 %v440_v37  ;;  %254 = vmatmul.mubr.bf16.vlgmr.msra.gmra.mxu1 %v443_v38 }
 0x104   :  { %v404_v39 = vpop.f32.mrf.mxu0  ;;  %v410_v40 = vpop.f32.mrf.mxu1 }
 0x106   :  { %v405_v41 = vpop.f32.mrf.mxu0  ;;  %v411_v42 = vpop.f32.mrf.mxu1 }
 0x107   :  { %v406_v47 = vadd.f32 %v405_v41, %v404_v39  ;;  %v412_v48 = vadd.f32 %v411_v42, %v410_v40 }
 0x108   :  { %v407_v43 = vpop.f32.mrf.mxu0  ;;  %v413_v44 = vpop.f32.mrf.mxu1 }
 0x10a   :  { %v408_v45 = vpop.f32.mrf.mxu0  ;;  %v414_v46 = vpop.f32.mrf.mxu1 }
 0x10b   :  { %v409_v49 = vadd.f32 %v408_v45, %v407_v43  ;;  %v415_v50 = vadd.f32 %v414_v46, %v413_v44 }
 0x10d   :  { %v380_v51 = vpack.c.bf16 %v409_v49, %v406_v47  ;;  %v385_v52 = vpack.c.bf16 %v415_v50, %v412_v48 }
 0x10f   :  { %381 = vst [vmem:[#allocation7] sm:$0xff] %v380_v51   ;;  %387 = vst [vmem:[#allocation7 + $0x8] sm:$0xff] %v385_v52  }
 0x110   :  { %497 = shalt.err (!%p494_p0)
}
 0x111   :  { %s518_s23 = smov 64   ;;  %s519_s24 = smov 4  }
 0x112   :  { %293 = dma.vmem_to_hbm [thread:$0]  %s288_s1, 256, %s652_s2, [#allocation4], %s518_s23, %s518_s23, %s519_s24  }
 0x113   :  { %510 = dma.done.wait [#allocation4], 256  }
 0x114   :  { %511 = vsyncadd [#allocation4], 4294967040 }
 0x115   :  { %297 = vsyncpa [#allocation3], 1 }
 0x116   :  { %298 = vsyncpa [#allocation6], 1 }
 0x117   :  { %299 = vsyncpa [#allocation4], 1 }

</bundles_post_ra>
